<compile_context>
chip_gen: v7x
topology: tpu7x:2x2x1
jax: 0.10.0
libtpu: 0.0.40
codegen_flags: <defaults>
</compile_context>

<pallas_src>
import jax
import jax.numpy as jnp
from jax.experimental import pallas as pl
from jax.experimental.pallas import tpu as pltpu


def _round_up(x, m):
    return (x + m - 1) // m * m


def _bridge_kernel(x_ref, w_ref, b_ref, o_ref, acc_ref):
    """One (state, row-tile, col-tile, k-chunk) grid step of tanh(X @ W + b)."""
    k = pl.program_id(3)

    @pl.when(k == 0)
    def _init():
        # Bias add folded into accumulator init (free; no per-K re-add).
        acc_ref[...] = jnp.zeros_like(acc_ref) + b_ref[...].astype(jnp.float32)

    acc_ref[...] += jnp.dot(x_ref[...], w_ref[...],
                            preferred_element_type=jnp.float32)

    @pl.when(k == pl.num_programs(3) - 1)
    def _finalize():
        # tanh epilogue on the EUP, single unmasked lane-dense store.
        o_ref[...] = jnp.tanh(acc_ref[...]).astype(o_ref.dtype)


def bridge_matmul(x_chunks, w_chunks, bias, *, compute_dtype=None):
    """
    Fused, tiled  tanh(X @ W + b)  for all RNN states in a single pallas_call.

    x_chunks : (S, C, M, H)  per-state inputs, chunked along K (K_total = C*H)
               -- this is the hidden state in its native (layer*dir, batch, H)
               layout (optionally with the fusion vector prepended as chunk 0).
    w_chunks : (S, C, H, N)  per-state weights, chunked the same way along K.
    bias     : (S, 1, N)     per-state bias.
    returns  : (S, M, N) float32
    """
    if compute_dtype is not None:
        # e.g. bf16 on v6e/v7x: halves HBM/VMEM bytes for W, doubles MXU rate;
        # accumulation and the bias/tanh epilogue stay f32.
        x_chunks = x_chunks.astype(compute_dtype)
        w_chunks = w_chunks.astype(compute_dtype)

    S, C, M, H = x_chunks.shape
    N = w_chunks.shape[-1]

    # Lane/sublane-dense padding: rows -> x8 (sublanes), out features -> x128 (lanes).
    M_pad = _round_up(M, 8)
    tm = min(M_pad, 256)
    M_pad = _round_up(M_pad, tm)
    N_pad = _round_up(N, 128)
    tn = min(N_pad, 256)
    N_pad = _round_up(N_pad, tn)

    if M_pad != M:
        x_chunks = jnp.pad(x_chunks, ((0, 0), (0, 0), (0, M_pad - M), (0, 0)))
    if N_pad != N:
        w_chunks = jnp.pad(w_chunks, ((0, 0), (0, 0), (0, 0), (0, N_pad - N)))
        bias = jnp.pad(bias, ((0, 0), (0, 0), (0, N_pad - N)))

    grid = (S, M_pad // tm, N_pad // tn, C)

    itemsize = jnp.dtype(x_chunks.dtype).itemsize
    cost = pl.CostEstimate(
        flops=2 * S * M_pad * N_pad * C * H,
        transcendentals=S * M_pad * N_pad,
        bytes_accessed=itemsize * (x_chunks.size + w_chunks.size)
        + 4 * (bias.size + S * M_pad * N_pad),
    )

    out = pl.pallas_call(
        _bridge_kernel,
        out_shape=jax.ShapeDtypeStruct((S, M_pad, N_pad), jnp.float32),
        grid_spec=pltpu.PrefetchScalarGridSpec(
            num_scalar_prefetch=0,
            grid=grid,
            in_specs=[
                # X: native-layout hidden chunk (tm, H); last dim equals full H.
                pl.BlockSpec((pl.Squeezed(), pl.Squeezed(), tm, H),
                             lambda s, i, j, k: (s, k, i, 0)),
                # W: (H, tn) chunk; block index independent of the row tile i,
                # so the weight tile stays resident across the batch tiles.
                pl.BlockSpec((pl.Squeezed(), pl.Squeezed(), H, tn),
                             lambda s, i, j, k: (s, k, 0, j)),
                # bias: (1, tn)
                pl.BlockSpec((pl.Squeezed(), 1, tn),
                             lambda s, i, j, k: (s, 0, j)),
            ],
            # Output block index ignores k -> accumulator pattern over the
            # (last, "arbitrary") reduction axis.
            out_specs=pl.BlockSpec((pl.Squeezed(), tm, tn),
                                   lambda s, i, j, k: (s, i, j)),
            scratch_shapes=[pltpu.VMEM((tm, tn), jnp.float32)],
        ),
        compiler_params=pltpu.CompilerParams(
            dimension_semantics=("parallel", "parallel", "parallel", "arbitrary"),
            vmem_limit_bytes=32 * 1024 * 1024,
        ),
        cost_estimate=cost,
    )(x_chunks, w_chunks, bias)

    return out[:, :M, :N]


class LinearBridgeJAX:
    """JAX/Pallas port of LinearBridge (eval mode; dropout is identity)."""

    def __init__(self, bridge, rnn_type, hidden_size, num_layers, dropout, bi_rnn,
                 key, compute_dtype=None):
        number_of_states = 2 if rnn_type == "lstm" else 1
        self.number_of_states = number_of_states
        self.total_hidden_dim = hidden_size * num_layers
        self.hidden_size = hidden_size
        self.bridge_mode = bridge
        self.bi_rnn = 2 if bi_rnn else 1
        self.compute_dtype = compute_dtype
        # TODO(synk): stochastic training-time dropout not implemented (p=0 / eval => identity).

        if bridge == "general":
            in_dim = self.total_hidden_dim * self.bi_rnn
        elif bridge == "fusion":
            in_dim = self.total_hidden_dim * self.bi_rnn + hidden_size
        else:
            raise ValueError(bridge)
        out_dim = self.total_hidden_dim
        self.in_dim, self.out_dim = in_dim, out_dim

        # Deterministic init mimicking torch.nn.Linear: U(-1/sqrt(in), 1/sqrt(in)).
        bound = 1.0 / (in_dim ** 0.5)
        keys = jax.random.split(key, 2 * number_of_states)
        self.params = []
        for i in range(number_of_states):
            w = jax.random.uniform(keys[2 * i], (in_dim, out_dim), jnp.float32, -bound, bound)
            b = jax.random.uniform(keys[2 * i + 1], (out_dim,), jnp.float32, -bound, bound)
            self.params.append((w, b))

        # Pre-packed kernel layout: weights chunked along K by hidden_size rows so the
        # kernel's K-reduction axis directly consumes the hidden state in its native
        # (num_layers*num_dirs, batch, hidden) layout (no wrapper transpose of X).
        n_chunks = in_dim // hidden_size
        self.w_chunks = jnp.stack(
            [w.reshape(n_chunks, hidden_size, out_dim) for (w, _) in self.params])   # (S,C,H,N)
        self.b_packed = jnp.stack(
            [b.reshape(1, out_dim) for (_, b) in self.params])                        # (S,1,N)

    def __call__(self, hidden, fusion_knowledge=None, posterior_hidden=None):
        if self.bridge_mode == "general":
            assert fusion_knowledge is None
        else:
            assert fusion_knowledge is not None
        assert posterior_hidden is None

        is_tuple = isinstance(hidden, tuple)
        states = hidden if is_tuple else (hidden,)
        assert len(states) == self.number_of_states

        ldirs, batch, h = states[0].shape
        assert h == self.hidden_size
        assert ldirs * h == self.bi_rnn * self.total_hidden_dim

        x = jnp.stack(states)                                   # (S, Ldirs, B, H) native layout
        if fusion_knowledge is not None:
            # Fusion vector occupies the FIRST K chunk (matches torch.cat([fusion, flat])).
            fk = jnp.broadcast_to(fusion_knowledge[None, None, :, :],
                                  (len(states), 1, batch, h))
            x = jnp.concatenate([fk, x], axis=1)

        out = bridge_matmul(x, self.w_chunks, self.b_packed,
                            compute_dtype=self.compute_dtype)   # (S, B, total_hidden_dim)

        # (S, B, L*H) -> per state (Ldirs, B, H // bi)  (same as reference .view + .permute)
        out = out.reshape(len(states), batch, ldirs, h // self.bi_rnn)
        out = jnp.transpose(out, (0, 2, 1, 3))
        if is_tuple:
            return tuple(out[s] for s in range(len(states)))
        return out[0]


def _reference_bottle(params, states, bi_rnn, fusion=None):
    """Pure-JAX reference matching the PyTorch bottle_hidden."""
    w, b = params
    states_p = jnp.transpose(states, (1, 0, 2))              # (B, Ldirs, H)
    size = states_p.shape
    flat = states_p.reshape(size[0], size[1] * size[2])
    if fusion is not None:
        flat = jnp.concatenate([fusion, flat], axis=-1)
    result = jnp.tanh(flat @ w + b)
    result = result.reshape(size[0], size[1], size[2] // bi_rnn)
    return jnp.transpose(result, (1, 0, 2))


if __name__ == "__main__":
    # Small config: LSTM (2 states), bidirectional, 2 layers, hidden=32, batch=2
    hidden_size, num_layers, batch, bi = 32, 2, 2, 2
    key = jax.random.PRNGKey(0)
    k_param, k_param_f, k_h, k_c, k_f = jax.random.split(key, 5)

    # PyTorch LSTM hidden layout: (num_layers * num_directions, batch, hidden_size)
    h = jax.random.normal(k_h, (num_layers * bi, batch, hidden_size), jnp.float32)
    c = jax.random.normal(k_c, (num_layers * bi, batch, hidden_size), jnp.float32)

    # --- bridge='general' ---
    bridge = LinearBridgeJAX("general", "lstm", hidden_size, num_layers,
                             dropout=0.0, bi_rnn=True, key=k_param)
    outs = jax.block_until_ready(bridge((h, c)))

    ref_h = _reference_bottle(bridge.params[0], h, bridge.bi_rnn)
    ref_c = _reference_bottle(bridge.params[1], c, bridge.bi_rnn)
    assert outs[0].shape == (num_layers * bi, batch, hidden_size // bi)
    assert outs[1].shape == (num_layers * bi, batch, hidden_size // bi)
    assert jnp.allclose(outs[0], ref_h, atol=2e-5, rtol=2e-5)
    assert jnp.allclose(outs[1], ref_c, atol=2e-5, rtol=2e-5)

    # --- bridge='fusion' (extra knowledge vector concatenated in front) ---
    bridge_f = LinearBridgeJAX("fusion", "lstm", hidden_size, num_layers,
                               dropout=0.0, bi_rnn=True, key=k_param_f)
    fk = jax.random.normal(k_f, (batch, hidden_size), jnp.float32)
    outs_f = jax.block_until_ready(bridge_f((h, c), fusion_knowledge=fk))
    ref_fh = _reference_bottle(bridge_f.params[0], h, bridge_f.bi_rnn, fusion=fk)
    ref_fc = _reference_bottle(bridge_f.params[1], c, bridge_f.bi_rnn, fusion=fk)
    assert jnp.allclose(outs_f[0], ref_fh, atol=2e-5, rtol=2e-5)
    assert jnp.allclose(outs_f[1], ref_fc, atol=2e-5, rtol=2e-5)

    print("KERNEL_OK")
</pallas_src>

<mosaic_0001>
module attributes {stable_mosaic.version = 11 : i64} {
  func.func @_bridge_kernel(%arg0: i32, %arg1: i32, %arg2: i32, %arg3: i32, %arg4: memref<1x1x8x32xf32, #tpu.memory_space<vmem>>, %arg5: memref<1x1x32x128xf32, #tpu.memory_space<vmem>>, %arg6: memref<1x1x128xf32, #tpu.memory_space<vmem>>, %arg7: memref<1x8x128xf32, #tpu.memory_space<vmem>>, %arg8: memref<8x128xf32, #tpu.memory_space<vmem>>) attributes {dimension_semantics = [#tpu.dimension_semantics<parallel>, #tpu.dimension_semantics<parallel>, #tpu.dimension_semantics<parallel>, #tpu.dimension_semantics<arbitrary>], iteration_bounds = array<i64: 2, 1, 1, 4>, scalar_prefetch = 0 : i64, scratch_operands = 1 : i64, tpu.core_type = #tpu.core_type<tc>, window_params = [{transform_indices = @transform_0, window_bounds = array<i64: 1, 1, 8, 32>}, {transform_indices = @transform_1, window_bounds = array<i64: 1, 1, 32, 128>}, {transform_indices = @transform_2, window_bounds = array<i64: 1, 1, 128>}, {transform_indices = @transform_3, window_bounds = array<i64: 1, 8, 128>}]} {
    %c0_i32 = arith.constant 0 : i32
    %0 = arith.cmpi eq, %arg3, %c0_i32 : i32
    %1 = arith.extui %0 : i1 to i32
    %c0_i32_0 = arith.constant 0 : i32
    %2 = arith.cmpi ne, %1, %c0_i32_0 : i32
    scf.if %2 {
      %cst_13 = arith.constant 0.000000e+00 : f32
      %14 = vector.broadcast %cst_13 : f32 to vector<8x128xf32>
      %c0_14 = arith.constant 0 : index
      %c0_15 = arith.constant 0 : index
      %c0_16 = arith.constant 0 : index
      %15 = vector.load %arg6[%c0_14, %c0_15, %c0_16] : memref<1x1x128xf32, #tpu.memory_space<vmem>>, vector<1x1x128xf32>
      %16 = vector.shape_cast %15 : vector<1x1x128xf32> to vector<1x128xf32>
      %17 = vector.broadcast %16 : vector<1x128xf32> to vector<8x128xf32>
      %18 = arith.addf %14, %17 : vector<8x128xf32>
      %c0_17 = arith.constant 0 : index
      %c0_18 = arith.constant 0 : index
      %19 = vector.load %arg8[%c0_17, %c0_18] : memref<8x128xf32, #tpu.memory_space<vmem>>, vector<8x128xf32>
      tpu.vector_store %arg8[%c0_17, %c0_18], %18 {strides = array<i32>} : memref<8x128xf32, #tpu.memory_space<vmem>>, vector<8x128xf32>,
    } else {
    }
    %c0 = arith.constant 0 : index
    %c0_1 = arith.constant 0 : index
    %3 = vector.load %arg8[%c0, %c0_1] : memref<8x128xf32, #tpu.memory_space<vmem>>, vector<8x128xf32>
    %c0_2 = arith.constant 0 : index
    %c0_3 = arith.constant 0 : index
    %c0_4 = arith.constant 0 : index
    %c0_5 = arith.constant 0 : index
    %4 = vector.load %arg4[%c0_2, %c0_3, %c0_4, %c0_5] : memref<1x1x8x32xf32, #tpu.memory_space<vmem>>, vector<1x1x8x32xf32>
    %5 = vector.shape_cast %4 : vector<1x1x8x32xf32> to vector<8x32xf32>
    %c0_6 = arith.constant 0 : index
    %c0_7 = arith.constant 0 : index
    %c0_8 = arith.constant 0 : index
    %c0_9 = arith.constant 0 : index
    %6 = vector.load %arg5[%c0_6, %c0_7, %c0_8, %c0_9] : memref<1x1x32x128xf32, #tpu.memory_space<vmem>>, vector<1x1x32x128xf32>
    %7 = vector.shape_cast %6 : vector<1x1x32x128xf32> to vector<32x128xf32>
    %cst = arith.constant dense<0.000000e+00> : vector<8x128xf32>
    %8 = tpu.matmul %5, %7, %cst {dimension_numbers = #tpu.dot_dimension_numbers<[1], [0], [0], [1], [0, 0, 1, 1], [], []>} : vector<8x32xf32>, vector<32x128xf32>, vector<8x128xf32> -> vector<8x128xf32>
    %9 = arith.addf %3, %8 : vector<8x128xf32>
    %c0_10 = arith.constant 0 : index
    %c0_11 = arith.constant 0 : index
    %10 = vector.load %arg8[%c0_10, %c0_11] : memref<8x128xf32, #tpu.memory_space<vmem>>, vector<8x128xf32>
    tpu.vector_store %arg8[%c0_10, %c0_11], %9 {strides = array<i32>} : memref<8x128xf32, #tpu.memory_space<vmem>>, vector<8x128xf32>,
    %c3_i32 = arith.constant 3 : i32
    %11 = arith.cmpi eq, %arg3, %c3_i32 : i32
    %12 = arith.extui %11 : i1 to i32
    %c0_i32_12 = arith.constant 0 : i32
    %13 = arith.cmpi ne, %12, %c0_i32_12 : i32
    scf.if %13 {
      %c0_13 = arith.constant 0 : index
      %c0_14 = arith.constant 0 : index
      %14 = vector.load %arg8[%c0_13, %c0_14] : memref<8x128xf32, #tpu.memory_space<vmem>>, vector<8x128xf32>
      %15 = math.tanh %14 : vector<8x128xf32>
      %c0_15 = arith.constant 0 : index
      %c0_16 = arith.constant 0 : index
      %c0_17 = arith.constant 0 : index
      %16 = vector.load %arg7[%c0_15, %c0_16, %c0_17] : memref<1x8x128xf32, #tpu.memory_space<vmem>>, vector<1x8x128xf32>
      %17 = vector.shape_cast %16 : vector<1x8x128xf32> to vector<8x128xf32>
      %18 = vector.shape_cast %15 : vector<8x128xf32> to vector<1x8x128xf32>
      tpu.vector_store %arg7[%c0_15, %c0_16, %c0_17], %18 {strides = array<i32>} : memref<1x8x128xf32, #tpu.memory_space<vmem>>, vector<1x8x128xf32>,
    } else {
    }
    return
  }
  func.func @transform_0(%arg0: i32, %arg1: i32, %arg2: i32, %arg3: i32) -> (i32, i32, i32, i32) {
    %c0_i32 = arith.constant 0 : i32
    %c0_i32_0 = arith.constant 0 : i32
    return %arg0, %arg3, %arg1, %c0_i32 : i32, i32, i32, i32
  }
  func.func @transform_1(%arg0: i32, %arg1: i32, %arg2: i32, %arg3: i32) -> (i32, i32, i32, i32) {
    %c0_i32 = arith.constant 0 : i32
    %c0_i32_0 = arith.constant 0 : i32
    return %arg0, %arg3, %c0_i32, %arg2 : i32, i32, i32, i32
  }
  func.func @transform_2(%arg0: i32, %arg1: i32, %arg2: i32, %arg3: i32) -> (i32, i32, i32) {
    %c0_i32 = arith.constant 0 : i32
    %c0_i32_0 = arith.constant 0 : i32
    return %arg0, %c0_i32, %arg2 : i32, i32, i32
  }
  func.func @transform_3(%arg0: i32, %arg1: i32, %arg2: i32, %arg3: i32) -> (i32, i32, i32) {
    %c0_i32 = arith.constant 0 : i32
    return %arg0, %arg1, %arg2 : i32, i32, i32
  }
}

</mosaic_0001>

<bundles_post_ra>
// kernel: tpu_custom_call.1
= control target key start
LH: loop header
LB: loop body
LE: loop exit
PB: predicated region body
PF: predicated region fallthrough
CT: control target
= control target key end

     0   :  { %s1202_s0 = inlined_call_operand.hbm [shape: f32[2,4,8,32], index: 0, kind: input, shape index: {}]   ;;  %s1203_s1 = inlined_call_operand.hbm [shape: f32[2,4,32,128], index: 1, kind: input, shape index: {}]   ;;  %s1204_s2 = inlined_call_operand.vmem [shape: f32[2,1,128], index: 2, kind: input, shape index: {}]   ;;  %s1205_s3 = inlined_call_operand.hbm [shape: f32[2,8,128], index: 3, kind: output, shape index: {}]  }
   0x1   :  { %1211 = sst [smem:[#allocation17_spill]] %s1202_s0 }
   0x2   :  { %8 = vsyncpa [#allocation4], 0 }
   0x3   :  { %10 = vsyncpa [#allocation4 + $0x1], 0 }
   0x4   :  { %11 = vsyncpa [#allocation7], 0 }
   0x5   :  { %13 = vsyncpa [#allocation7 + $0x1], 0 }
   0x6   :  { %14 = vsyncpa [#allocation5], 0 }
   0x7   :  { %16 = vsyncpa [#allocation5 + $0x1], 0  ;;  %s919_s12 = smov 0   ;;  %s921_s13 = smov 0  }
   0x8   :  { %s923_s14 = smov 0   ;;  %s925_s15 = smov 0  }
   0x9   :  { %s927_s16 = smov 0   ;;  %s929_s17 = smov 0  }
   0xa   :  { %s931_s18 = smov 0   ;;  %s933_s19 = smov 0  }
   0xb   :  { %s935_s20 = smov 0   ;;  %s937_s21 = smov 0  }
   0xc   :  { %s939_s22 = smov 0  }
   0xd LB: > { %1212 = sst [smem:[#allocation12_spill]] %s869_s17  ;;  %s544_s23 = sadd.s32 4294967295, %s889_s22   ;;  %s889_s22 = sphi %s939_s22, %s22_s22   ;;  %s885_s21 = sphi %s937_s21, %s1242_s21   ;;  %s881_s20 = sphi %s935_s20, %s1241_s20   ;;  %s877_s19 = sphi %s933_s19, %s1240_s19   ;;  %s873_s18 = sphi %s931_s18, %s1239_s18   ;;  %s869_s17 = sphi %s929_s17, %s1231_s17   ;;  %s865_s16 = sphi %s927_s16, %s1238_s16   ;;  %s861_s15 = sphi %s925_s15, %s1237_s15   ;;  %s857_s14 = sphi %s923_s14, %s1236_s14   ;;  %s853_s13 = sphi %s921_s13, %s1235_s13   ;;  %s849_s12 = sphi %s919_s12, %s1234_s12  }
   0xe   : > { %s545_s24 = sadd.s32 4294967294, %s889_s22   ;;  %s37_s25 = sadd.s32 1, %s881_s20 }
   0xf   : > { %s48_s26 = sadd.s32 1, %s885_s21  ;;  %p38_p0 = scmp.ge.s32.totalorder %s37_s25, 4 }
  0x10   : > { %s59_s27 = sadd.s32 1, %s869_s17  ;;  %p66_p1 = scmp.ne.s32.totalorder %s869_s17, %s865_s16 }
  0x11   : > { %p67_p2 = scmp.eq.s32.totalorder %s889_s22, 0  ;;  %s1244_s25 = smov (%p38_p0, %s37_s25), 0 }
  0x12   : > { %1213 = sst [smem:[#allocation13_spill]] %s1244_s25  ;;  %s1246_s26 = smov (!%p38_p0, %s48_s26), %s885_s21 }
  0x13   : > { %s53_s28 = ssub.s32 %s881_s20, %s1244_s25  ;;  %p985_p3 = por %p67_p2, %p66_p1 }
  0x14   : > { %p50_p4 = scmp.ge.s32.totalorder %s1246_s26, 2  ;;  %p72_p5 = scmp.ne.s32.totalorder %s865_s16, %s861_s15 }
  0x15   : > { %p73_p6 = scmp.eq.s32.totalorder %s544_s23, 0  ;;  %s147_s30 = sadd.s32 1, %s857_s14 }
  0x16   : > { %s1248_s26 = smov (%p50_p4, %s1246_s26), 0  ;;  %p157_p8 = scmp.ne.s32.totalorder %s857_s14, %s853_s13 }
  0x17   : > { %1215 = sst [smem:[#allocation14_spill]] %s1248_s26  ;;  %p993_p7 = por %p73_p6, %p72_p5 }
  0x18   : > { %s52_s5 = ssub.s32 %s885_s21, %s1248_s26  ;;  %p158_p9 = scmp.eq.s32.totalorder %s544_s23, 7 }
  0x19   : > { %s1216_s4 = scalar_select %p993_p7, 1, 0 }
  0x1a   : > { %s54_s6 = sor.u32 %s53_s28, %s52_s5  ;;  %p145_p10 = scmp.eq.s32.totalorder %s52_s5, 0 }
  0x1b   : > { %p57_p11 = scmp.eq.s32.totalorder %s54_s6, 0  ;;  %p1001_p12 = por %p158_p9, %p157_p8 }
  0x1c   : > { %s1006_s8 = scalar_select %p145_p10, %s857_s14, %s147_s30  }
  0x1d   : > { %s1217_s7 = scalar_select %p1001_p12, 1, 0 }
  0x1e   : > { %1218 = sst [smem:[#allocation15_spill]] %s1006_s8  ;;  %p163_p13 = scmp.ne.s32.totalorder %s853_s13, %s849_s12 }
  0x1f   : > { %s1009_s9 = scalar_select %p57_p11, %s869_s17, %s59_s27  }
  0x20   : > { %p164_p0 = scmp.eq.s32.totalorder %s545_s24, 7  ;;  %p606_p1 = scmp.lt.s32.totalorder %s889_s22, 8 }
  0x21   : > { %1219 = sst [smem:[#allocation16_spill]] %s1009_s9  ;;  %s1019_s11 = sand.u32 1, %s869_s17  }
  0x22   : > { %p1014_p2 = por %p164_p0, %p163_p13  ;;  %s548_s15 = sshll.u32 %s1019_s11, 3 }
  0x23   : > { %s549_s23 = sshll.u32 %s885_s21, 2  ;;  %s188_s30 = scalar_lea.vmem [#allocation3], %s548_s15 }
  0x24   : > { %s1220_s10 = scalar_select %p1014_p2, 1, 0 }
  0x25   : > { %s194_s28 = sadd.s32 %s881_s20, %s549_s23  ;;  %s198_s5 = sshll.u32 %s188_s30, 4  ;;  %s1024_s5 = int_to_ptr.vmem [resolvable:$true] %s198_s5 }
  0x26   : > { %s550_s6 = sshll.u32 %s194_s28, 7  ;;  %s1221_s0 = sld [smem:[#allocation17_spill]] }
  0x27   : > { %p1033_p4 = pnand %p606_p1, %p985_p3  ;;  %s185_s15 = scalar_lea.sflag [#allocation4], %s1019_s11 }
  0x29   : > { %p705_p9 = pneg %p1033_p4 }
  0x2c   : > { %s1029_s24 = scalar_lea.hbm %s1221_s0, %s550_s6  ;;  %s708_s28 = scalar_lea.hbm %s1221_s0, 1024 }
  0x2d   : > { %s703_s23 = scalar_lea.hbm %s1029_s24, 128  ;;  %p709_p3 = scmp.lt.u32.totalorder %s1029_s24, %s1221_s0 }
  0x2e   : > { %p704_p8 = scmp.ne.s32.totalorder %s1029_s24, %s703_s23  ;;  %p710_p13 = scmp.lt.u32.totalorder %s708_s28, %s703_s23 }
  0x2f   : > { %p712_p1 = scmp.lt.u32.totalorder %s703_s23, %s1029_s24 }
  0x30   : > { %p706_p10 = pnand %p705_p9, %p704_p8  ;;  %p711_p0 = por %p710_p13, %p709_p3 }
  0x32   : > { %p707_p11 = pneg %p706_p10  ;;  %p713_p5 = por %p712_p1, %p711_p0 }
  0x34   : > { %p714_p6 = pnand %p713_p5, %p707_p11 }
  0x36   : > { %717 = shalt.err (!%p714_p6)
}
  0x37   : > { %s718_s27 = scalar_lea.vmem %s1024_s5, 128  ;;  %s891_s26 = smov [#allocation3]  }
  0x38   : > { %p719_p8 = scmp.ne.s32.totalorder %s1024_s5, %s718_s27  ;;  %s723_s29 = sshll.u32 %s891_s26, 4  ;;  %s724_s29 = int_to_ptr.vmem [resolvable:$false] %s723_s29 }
  0x39   : > { %s725_s30 = scalar_lea.vmem %s724_s29, 256  ;;  %p726_p12 = scmp.lt.s32.totalorder %s1024_s5, %s724_s29 }
  0x3a   : > { %p721_p10 = pnand %p719_p8, %p705_p9  ;;  %p727_p3 = scmp.lt.s32.totalorder %s725_s30, %s718_s27 }
  0x3c   : > { %p722_p2 = pneg %p721_p10  ;;  %p728_p13 = por %p727_p3, %p726_p12 }
  0x3e   : > { %p729_p0 = pnand %p728_p13, %p722_p2 }
  0x40   : > { %732 = shalt.err (!%p729_p0)
}
  0x41   : > { %598 = dma.hbm_to_vmem [thread:$0]  (!%p1033_p4), %s1029_s24, 128, %s1024_s5, %s185_s15  }
  0x42   : > { %p1223_p5 = scmp.lt.s32.totalorder %s889_s22, 9  ;;  %p1224_p6 = scmp.ge.s32.totalorder %s889_s22, 1 }
  0x43   : > { %s551_s28 = sshll.u32 %s1019_s11, 5  ;;  %s552_s6 = sshll.u32 %s881_s20, 2 }
  0x44   : > { %p1069_p11 = pnand %p1224_p6, %p1223_p5  ;;  %s553_s27 = sshll.u32 %s885_s21, 4 }
  0x45   : > { %s209_s26 = scalar_lea.vmem [#allocation6], %s551_s28  ;;  %s216_s30 = sadd.s32 %s553_s27, %s552_s6 }
  0x46   : > { %s219_s29 = sshll.u32 %s209_s26, 4  ;;  %s554_s0 = sshll.u32 %s216_s30, 7  ;;  %s1076_s29 = int_to_ptr.vmem [resolvable:$true] %s219_s29 }
  0x47   : > { %s1081_s8 = scalar_lea.hbm %s1203_s1, %s554_s0  ;;  %s206_s5 = scalar_lea.sflag [#allocation7], %s1019_s11 }
  0x48   : > { %s733_s24 = scalar_lea.hbm %s1081_s8, 512  ;;  %s738_s6 = scalar_lea.hbm %s1203_s1, 4096 }
  0x49   : > { %p734_p12 = scmp.ne.s32.totalorder %s1081_s8, %s733_s24  ;;  %p739_p8 = scmp.lt.u32.totalorder %s1081_s8, %s1203_s1 }
  0x4a   : > { %p740_p10 = scmp.lt.u32.totalorder %s738_s6, %s733_s24  ;;  %p742_p13 = scmp.lt.u32.totalorder %s733_s24, %s1081_s8 }
  0x4b   : > { %p736_p2 = pnand %p734_p12, %p705_p9 }
  0x4c   : > { %p741_p3 = por %p740_p10, %p739_p8 }
  0x4d   : > { %p737_p1 = pneg %p736_p2 }
  0x4e   : > { %p743_p0 = por %p742_p13, %p741_p3 }
  0x50   : > { %p744_p5 = pnand %p743_p0, %p737_p1 }
  0x52   : > { %747 = shalt.err (!%p744_p5)
}
  0x53   : > { %s748_s0 = scalar_lea.vmem %s1076_s29, 512  ;;  %s892_s17 = smov [#allocation6]  }
  0x54   : > { %p749_p6 = scmp.ne.s32.totalorder %s1076_s29, %s748_s0  ;;  %s753_s9 = sshll.u32 %s892_s17, 4  ;;  %s754_s9 = int_to_ptr.vmem [resolvable:$false] %s753_s9 }
  0x55   : > { %s755_s30 = scalar_lea.vmem %s754_s9, 1024  ;;  %p756_p7 = scmp.lt.s32.totalorder %s1076_s29, %s754_s9 }
  0x56   : > { %p751_p12 = pnand %p749_p6, %p705_p9  ;;  %p757_p8 = scmp.lt.s32.totalorder %s755_s30, %s748_s0 }
  0x58   : > { %p752_p2 = pneg %p751_p12  ;;  %p758_p10 = por %p757_p8, %p756_p7 }
  0x5a   : > { %p759_p3 = pnand %p758_p10, %p752_p2 }
  0x5c   : > { %762 = shalt.err (!%p759_p3)
}
  0x5d   : > { %s893_s24 = smov 128   ;;  %s894_s15 = smov 8  }
  0x5e   : > { %601 = dma.hbm_to_vmem [thread:$0]  (!%p1033_p4), %s1081_s8, 512, %s1076_s29, %s206_s5, %s893_s24, %s893_s24, %s894_s15  }
  0x5f   : > { %240 = sbr.rel (%p1069_p11) target bundleno = 385 (0x181), region = 32  ;;  %s242_s28 = sand.u32 (!%p1069_p11), 1, %s865_s16  }
  0x60   : > { %s556_s6 = sshll.u32 (!%p1069_p11), %s242_s28, 3  ;;  %s243_s27 = scalar_lea.sflag (!%p1069_p11), [#allocation4], %s242_s28 }
  0x61   : > { %s1112_s26 = scalar_lea.vmem (!%p1069_p11), [#allocation3], %s556_s6  ;;  %p1226_p7 = scmp.ne.s32.totalorder (!%p1069_p11), %s1216_s4, 0 }
  0x66   : > { %836 = dma.done.wait (%p1226_p7), %s243_s27, 128  }
  0x67   : > { %838 = vsyncadd (%p1226_p7), %s243_s27, 4294967168  ;;  %s557_s0 = sshll.u32 %s242_s28, 5  ;;  %s252_s25 = scalar_lea.sflag [#allocation7], %s242_s28 }
  0x68   : > { %s255_s11 = scalar_lea.vmem [#allocation6], %s557_s0 }
  0x69   : > { %840 = dma.done.wait (%p1226_p7), %s252_s25, 512  }
  0x6a   : > { %842 = vsyncadd (%p1226_p7), %s252_s25, 4294966784  ;;  %s286_s8 = sand.u32 1, %s853_s13   ;;  %p289_p4 = scmp.lt.s32.totalorder %s877_s19, 1 }
  0x6b   : > { %s1126_s23 = sshll.u32 %s286_s8, 3  ;;  %p559_p9 = scmp.ne.s32.totalorder %s873_s18, 0 }
  0x6c   : > { %s290_s29 = scalar_select %p289_p4, %s877_s19, 1 }
  0x6d   : > { %s288_s30 = scalar_lea.vmem [#allocation8], %s1126_s23  ;;  %298 = sbr.rel (%p559_p9) target bundleno = 116 (0x74), region = 44 }
  0x6e   : > { %s294_s9 = scalar_lea.vmem %s1204_s2, %s290_s29 }
  0x6f   : > { %v560_v0 = vld [vmem:[%s294_s9] ss:$0 sm:$0xff] (!%p559_p9) }
  0x70   : > { %307 = vst [vmem:[#allocation2] sm:$0xff] (!%p559_p9), %v560_v0 }
  0x74 PF: > { %v310_v1 = vld [vmem:[%s255_s11] sm:$0xff]  ;;  %v311_v2 = vld [vmem:[%s255_s11 + $0x8] sm:$0xff]  ;;  %v312_v3 = vld [vmem:[%s255_s11 + $0x10] sm:$0xff]  ;;  %v895_v4 = vmov 0.0|0.0   ;;  %vm896_vm0 = vmmov 0   ;;  %v897_v7 = vmov 0.0  }
  0x75   : > { %583 = vmatprep.subr.bf16.mxu0 %v895_v4  ;;  %v584_v5 = vpack.c.bf16 %v311_v2, %v310_v1  ;;  %v313_v6 = vld [vmem:[%s255_s11 + $0x18] sm:$0xff]  ;;  %580 = vmatprep.mubr.msk.f32.mxu0 %vm896_vm0, %v897_v7  ;;  %vm314_vm1 = vcmask 261120   ;;  %p562_p11 = scmp.ne.s32.totalorder %s873_s18, 3 }
  0x76   : > { %v587_v8 = vpack.c.bf16 %v313_v6, %v312_v3  ;;  %v309_v9 = vld [vmem:[%s1112_s26] sm:$0xff] }
  0x77   : > { %585 = vmatpush3.bf16.msra.mxu0 %v584_v5  ;;  %v308_v10 = vld [vmem:[#allocation2] sm:$0xff] }
  0x78   : > { %586 = vmatprep.subr.bf16.mxu0 %v895_v4 }
  0x7b   : > { %588 = vmatpush3.bf16.msra.mxu0 %v587_v8 }
  0x7e   : > { %581 = vmatmul.mubr.msk.f32.vlgmr.msra.gmra.mrb[0].mxu0 %vm314_vm1, %v309_v9 }
 0x14e   : > { %393 = sbr.rel (%p562_p11) target bundleno = 360 (0x168), region = 48 }
 0x151   : > { %v384_v11 = vpop.f32.mrb[0].mxu0 }
 0x152   : > { %v388_v12 = vadd.f32 %v384_v11, %v308_v10  ;;  %v582_v13 = vpop.f32.mrb[1].mxu0 }
 0x154   : > { %389 = vst [vmem:[#allocation2] sm:$0xff] %v388_v12 }
 0x15b   : > { %v394_v14 = vld [vmem:[#allocation2] sm:$0xff] }
 0x15c   : > { %701 = vtanh.f32 %v394_v14 }
 0x166   : > { %v702_v15 = vpop.eup %701 }
 0x167   : > { %396 = vst [vmem:[%s288_s30] sm:$0xff] %v702_v15 }
 0x168 PF: > { %s564_s4 = sshll.u32 %s877_s19, 7  ;;  %s413_s18 = sshll.u32 %s288_s30, 4  ;;  %s414_s18 = int_to_ptr.vmem [resolvable:$true] %s413_s18 }
 0x169   : > { %s1142_s28 = scalar_lea.hbm %s1205_s3, %s564_s4  ;;  %s398_s6 = scalar_lea.sflag [#allocation5], %s286_s8 }
 0x16a   : > { %s763_s27 = scalar_lea.vmem %s414_s18, 128  ;;  %p1227_p13 = scmp.ne.s32.totalorder %s1217_s7, 0 }
 0x16b   : > { %p764_p1 = scmp.ne.s32.totalorder %s414_s18, %s763_s27  ;;  %s898_s26 = smov [#allocation8]  }
 0x16c   : > { %s767_s0 = sshll.u32 %s898_s26, 4  ;;  %s768_s0 = int_to_ptr.vmem [resolvable:$false] %s767_s0 }
 0x16d   : > { %p765_p0 = pnand %p764_p1, %p1227_p13  ;;  %s769_s25 = scalar_lea.vmem %s768_s0, 256 }
 0x16e   : > { %p770_p6 = scmp.lt.s32.totalorder %s414_s18, %s768_s0  ;;  %p771_p12 = scmp.lt.s32.totalorder %s769_s25, %s763_s27 }
 0x16f   : > { %p766_p5 = pneg %p765_p0 }
 0x170   : > { %p772_p2 = por %p771_p12, %p770_p6 }
 0x172   : > { %p773_p8 = pnand %p772_p2, %p766_p5 }
 0x174   : > { %776 = shalt.err (!%p773_p8)
}
 0x175   : > { %s777_s19 = scalar_lea.hbm %s1142_s28, 128  ;;  %s781_s23 = scalar_lea.hbm %s1205_s3, 256 }
 0x176   : > { %p778_p10 = scmp.ne.s32.totalorder %s1142_s28, %s777_s19  ;;  %p782_p4 = scmp.lt.u32.totalorder %s1142_s28, %s1205_s3 }
 0x177   : > { %p783_p9 = scmp.lt.u32.totalorder %s781_s23, %s777_s19  ;;  %p785_p1 = scmp.lt.u32.totalorder %s777_s19, %s1142_s28 }
 0x178   : > { %p779_p3 = pnand %p778_p10, %p1227_p13 }
 0x179   : > { %p784_p11 = por %p783_p9, %p782_p4 }
 0x17a   : > { %p780_p7 = pneg %p779_p3 }
 0x17b   : > { %p786_p0 = por %p785_p1, %p784_p11 }
 0x17d   : > { %p787_p5 = pnand %p786_p0, %p780_p7 }
 0x17f   : > { %790 = shalt.err (!%p787_p5)
}
 0x180   : > { %593 = dma.vmem_to_hbm [thread:$0]  (%p1227_p13), %s414_s18, 128, %s1142_s28, %s398_s6  }
 0x181 PF: > { %p607_p6 = scmp.ge.s32.totalorder %s889_s22, 2  ;;  %s425_s17 = sand.u32 1, %s849_s12  }
 0x182   : > { %p1228_p12 = scmp.ne.s32.totalorder %s1220_s10, 0  ;;  %s426_s9 = scalar_lea.sflag [#allocation5], %s425_s17 }
 0x184   : > { %p603_p2 = pnand %p607_p6, %p1228_p12 }
 0x186   : > { %844 = dma.done.wait (!%p603_p2), %s426_s9, 128  }
 0x187   : > { %846 = vsyncadd (!%p603_p2), %s426_s9, 4294967168  ;;  %s22_s22 = sadd.s32 1, %s889_s22   ;;  %s1229_s30 = sld [smem:[#allocation15_spill]] }
 0x188   : > { %p19_p8 = scmp.ge.s32.totalorder %s22_s22, 10   ;;  %s1230_s7 = sld [smem:[#allocation12_spill]] }
 0x189   : > { %s1231_s17 = sld [smem:[#allocation16_spill]]  ;;  %s1232_s4 = sld [smem:[#allocation13_spill]] }
 0x18a   : > { %s1233_s24 = sld [smem:[#allocation14_spill]]  ;;  %s1234_s12 = smov %s853_s13 }
 0x18b   : > { %s1235_s13 = smov %s857_s14  ;;  %s1237_s15 = smov %s865_s16 }
 0x18c   : > { %s1239_s18 = smov %s881_s20  ;;  %s1240_s19 = smov %s885_s21 }
 0x18d   : > { %s1236_s14 = smov %s1229_s30  ;;  %21 = sbr.rel (!%p19_p8) target bundleno = 13 (0xd), region = 101 }
 0x18e   : > { %s1238_s16 = smov %s1230_s7 }
 0x18f   : > { %s1241_s20 = smov %s1232_s4 }
 0x190   : > { %s1242_s21 = smov %s1233_s24 }
 0x194   :  { %431 = vsyncpa [#allocation4], 1 }
 0x195   :  { %433 = vsyncpa [#allocation4 + $0x1], 1 }
 0x196   :  { %434 = vsyncpa [#allocation7], 1 }
 0x197   :  { %436 = vsyncpa [#allocation7 + $0x1], 1 }
 0x198   :  { %437 = vsyncpa [#allocation5], 1 }
 0x199   :  { %439 = vsyncpa [#allocation5 + $0x1], 1 }

</bundles_post_ra>
